<compile_context>
chip_gen: v6e
topology: v6e:2x2x1
jax: 0.10.0
libtpu: 0.0.40
codegen_flags: <defaults>
</compile_context>

<pallas_src>
import jax
import jax.numpy as jnp
from jax.experimental import pallas as pl
from jax.experimental.pallas import tpu as pltpu


def _round_up(x, m):
    return ((x + m - 1) // m) * m


def _actnorm_kernel(x_ref, scale_ref, beta_ref, z_ref):
    # x_ref/z_ref: (rb, lb); scale_ref/beta_ref: (rb, 1) broadcast over lanes.
    z_ref[...] = x_ref[...] * scale_ref[...] + beta_ref[...]


def actnorm_forward(x, log_gamma, beta, *, max_row_block=512, max_lane_block=2048):
    """ActNorm forward.

    Args:
      x:         (N, C, H, W) float32
      log_gamma: (1, C, 1, 1) float32
      beta:      (1, C, 1, 1) float32
    Returns:
      z: (N, C, H, W) float32  (= x * exp(log_gamma) + beta)
      log_det: scalar float32  (= sum(log_gamma) * H * W)
    """
    n, c, h, w = x.shape
    hw = h * w
    nc = n * c

    # --- block sizing: sublane block multiple of 8, lane block multiple of 128
    rb = min(_round_up(nc, 8), max_row_block)
    lb = min(_round_up(hw, 128), max_lane_block)
    rows_p = _round_up(nc, rb)
    lanes_p = _round_up(hw, lb)

    # --- wrapper-side layout plumbing (cheap; XLA fuses it) ------------------
    x_flat = x.reshape(nc, hw)
    if rows_p != nc or lanes_p != hw:
        x_flat = jnp.pad(x_flat, ((0, rows_p - nc), (0, lanes_p - hw)))

    scale_c = jnp.exp(log_gamma.reshape(c))          # hoisted exp (C elements)
    beta_c = beta.reshape(c)
    scale_rows = jnp.tile(scale_c, (n,)).reshape(nc, 1)
    beta_rows = jnp.tile(beta_c, (n,)).reshape(nc, 1)
    if rows_p != nc:
        scale_rows = jnp.pad(scale_rows, ((0, rows_p - nc), (0, 0)))
        beta_rows = jnp.pad(beta_rows, ((0, rows_p - nc), (0, 0)))

    grid = (rows_p // rb, lanes_p // lb)

    cost = pl.CostEstimate(
        flops=2 * rows_p * lanes_p,
        transcendentals=0,
        bytes_accessed=2 * rows_p * lanes_p * 4 + 2 * rows_p * 4,
    )

    z_flat = pl.pallas_call(
        _actnorm_kernel,
        out_shape=jax.ShapeDtypeStruct((rows_p, lanes_p), x.dtype),
        grid_spec=pltpu.PrefetchScalarGridSpec(
            num_scalar_prefetch=0,
            grid=grid,
            in_specs=[
                pl.BlockSpec((rb, lb), lambda i, j: (i, j)),
                pl.BlockSpec((rb, 1), lambda i, j: (i, 0)),
                pl.BlockSpec((rb, 1), lambda i, j: (i, 0)),
            ],
            out_specs=pl.BlockSpec((rb, lb), lambda i, j: (i, j)),
        ),
        compiler_params=pltpu.CompilerParams(
            dimension_semantics=("parallel", "parallel"),
            vmem_limit_bytes=32 * 1024 * 1024,
        ),
        cost_estimate=cost,
    )(x_flat, scale_rows, beta_rows)

    z = z_flat[:nc, :hw].reshape(n, c, h, w)
    log_det = jnp.sum(log_gamma) * jnp.float32(hw)   # tiny reduction in plain JAX
    return z, log_det


if __name__ == "__main__":
    key = jax.random.PRNGKey(0)
    N, C, H, W = 2, 4, 16, 16

    kx, kg, kb = jax.random.split(key, 3)
    x = jax.random.normal(kx, (N, C, H, W), dtype=jnp.float32)
    # Deterministic "trained" parameters (module init is zeros; use small
    # nonzero values so the scale/shift path is actually exercised).
    log_gamma = (0.1 * jax.random.normal(kg, (1, C, 1, 1))).astype(jnp.float32)
    beta = (0.1 * jax.random.normal(kb, (1, C, 1, 1))).astype(jnp.float32)

    z, log_det = actnorm_forward(x, log_gamma, beta)
    jax.block_until_ready((z, log_det))

    # Reference check against plain JAX.
    z_ref = x * jnp.exp(log_gamma) + beta
    logdet_ref = jnp.sum(log_gamma) * H * W
    assert jnp.allclose(z, z_ref, atol=1e-5, rtol=1e-5)
    assert jnp.allclose(log_det, logdet_ref, atol=1e-5, rtol=1e-5)

    print("KERNEL_OK")
</pallas_src>

<mosaic_0001>
module attributes {stable_mosaic.version = 11 : i64} {
  func.func @_actnorm_kernel(%arg0: i32, %arg1: i32, %arg2: memref<8x256xf32, #tpu.memory_space<vmem>>, %arg3: memref<8x1xf32, #tpu.memory_space<vmem>>, %arg4: memref<8x1xf32, #tpu.memory_space<vmem>>, %arg5: memref<8x256xf32, #tpu.memory_space<vmem>>) attributes {dimension_semantics = [#tpu.dimension_semantics<parallel>, #tpu.dimension_semantics<parallel>], iteration_bounds = array<i64: 1, 1>, scalar_prefetch = 0 : i64, scratch_operands = 0 : i64, tpu.core_type = #tpu.core_type<tc>, window_params = [{transform_indices = @transform_0, window_bounds = array<i64: 8, 256>}, {transform_indices = @transform_1, window_bounds = array<i64: 8, 1>}, {transform_indices = @transform_2, window_bounds = array<i64: 8, 1>}, {transform_indices = @transform_3, window_bounds = array<i64: 8, 256>}]} {
    %c0 = arith.constant 0 : index
    %c0_0 = arith.constant 0 : index
    %0 = vector.load %arg2[%c0, %c0_0] : memref<8x256xf32, #tpu.memory_space<vmem>>, vector<8x256xf32>
    %c0_1 = arith.constant 0 : index
    %c0_2 = arith.constant 0 : index
    %1 = vector.load %arg3[%c0_1, %c0_2] : memref<8x1xf32, #tpu.memory_space<vmem>>, vector<8x1xf32>
    %2 = vector.broadcast %1 : vector<8x1xf32> to vector<8x256xf32>
    %3 = arith.mulf %0, %2 : vector<8x256xf32>
    %c0_3 = arith.constant 0 : index
    %c0_4 = arith.constant 0 : index
    %4 = vector.load %arg4[%c0_3, %c0_4] : memref<8x1xf32, #tpu.memory_space<vmem>>, vector<8x1xf32>
    %5 = vector.broadcast %4 : vector<8x1xf32> to vector<8x256xf32>
    %6 = arith.addf %3, %5 : vector<8x256xf32>
    %c0_5 = arith.constant 0 : index
    %c0_6 = arith.constant 0 : index
    %7 = vector.load %arg5[%c0_5, %c0_6] : memref<8x256xf32, #tpu.memory_space<vmem>>, vector<8x256xf32>
    tpu.vector_store %arg5[%c0_5, %c0_6], %6 {strides = array<i32>} : memref<8x256xf32, #tpu.memory_space<vmem>>, vector<8x256xf32>,
    return
  }
  func.func @transform_0(%arg0: i32, %arg1: i32) -> (i32, i32) {
    %c0_i32 = arith.constant 0 : i32
    return %arg0, %arg1 : i32, i32
  }
  func.func @transform_1(%arg0: i32, %arg1: i32) -> (i32, i32) {
    %c0_i32 = arith.constant 0 : i32
    %c0_i32_0 = arith.constant 0 : i32
    return %arg0, %c0_i32 : i32, i32
  }
  func.func @transform_2(%arg0: i32, %arg1: i32) -> (i32, i32) {
    %c0_i32 = arith.constant 0 : i32
    %c0_i32_0 = arith.constant 0 : i32
    return %arg0, %c0_i32 : i32, i32
  }
  func.func @transform_3(%arg0: i32, %arg1: i32) -> (i32, i32) {
    %c0_i32 = arith.constant 0 : i32
    return %arg0, %arg1 : i32, i32
  }
}

</mosaic_0001>

<bundles_post_ra>
// kernel: tpu_custom_call.1
= control target key start
LH: loop header
LB: loop body
LE: loop exit
PB: predicated region body
PF: predicated region fallthrough
CT: control target
= control target key end

     0   :  { %v74_v1 = vmov 0   ;;  %s111_s0 = inlined_call_operand.vmem [shape: f32[8,256], index: 0, kind: input, shape index: {}]   ;;  %s112_s1 = inlined_call_operand.vmem [shape: f32[8,1], index: 1, kind: input, shape index: {}]   ;;  %s113_s2 = inlined_call_operand.vmem [shape: f32[8,1], index: 2, kind: input, shape index: {}]   ;;  %s114_s3 = inlined_call_operand.hbm [shape: f32[8,256], index: 3, kind: output, shape index: {}]  }
   0x1   :  { %v17_v0 = vld [vmem:[%s112_s1] sm:$0xff]  ;;  %51 = vset.pattern.permute.xlu0 %v74_v1 }
   0x2   :  { %8 = vsyncpa [#allocation3], 0  ;;  %20 = vperm.xlu0 %51, %v17_v0   ;;  %v25_v2 = vld [vmem:[%s113_s2] sm:$0xff]  ;;  %v16_v5 = vld [vmem:[%s111_s0 + $0x8] sm:$0xff]  ;;  %s75_s20 = smov [#allocation2]  }
   0x3   :  { %v15_v4 = vld [vmem:[%s111_s0] sm:$0xff]  ;;  %s41_s1 = sshll.u32 %s75_s20, 4  ;;  %s42_s1 = int_to_ptr.vmem [resolvable:$true] %s41_s1 }
   0x4   :  { %s52_s2 = scalar_lea.vmem %s42_s1, 256  ;;  %p57_p1 = scmp.lt.s32.totalorder %s42_s1, %s42_s1 }
   0x5   :  { %p53_p0 = scmp.ne.s32.totalorder %s42_s1, %s52_s2  ;;  %p58_p2 = scmp.lt.s32.totalorder %s52_s2, %s52_s2 }
   0x6   :  { %28 = vperm.xlu0 %51, %v25_v2  }
   0x7   :  { %p59_p3 = por %p58_p2, %p57_p1 }
   0x9   :  { %p60_p4 = pnand %p59_p3, %p53_p0 }
  0x7d   :  { %v21_v3 = vpop.permute.xlu0 %20 }
  0x7e   :  { %v23_v6 = vmul.f32 %v21_v3, %v15_v4  ;;  %v24_v7 = vmul.f32 %v21_v3, %v16_v5 }
  0x81   :  { %v29_v8 = vpop.permute.xlu0 %28 }
  0x82   :  { %v31_v9 = vadd.f32 %v29_v8, %v23_v6  ;;  %v32_v10 = vadd.f32 %v29_v8, %v24_v7 }
  0x84   :  { %33 = vst [vmem:[#allocation2] sm:$0xff] %v31_v9  ;;  %34 = vst [vmem:[#allocation2 + $0x8] sm:$0xff] %v32_v10 }
  0x85   :  { %63 = shalt.err (!%p60_p4)
}
  0x86   :  { %44 = dma.vmem_to_hbm [thread:$0]  %s42_s1, 256, %s114_s3, [#allocation3]  }
  0x87   :  { %72 = dma.done.wait [#allocation3], 256  }
  0x88   :  { %73 = vsyncadd [#allocation3], 4294967040 }
  0x89   :  { %48 = vsyncpa [#allocation3], 1 }

</bundles_post_ra>
